<compile_context>
chip_gen: v7x
topology: tpu7x:2x2x1
jax: 0.10.0
libtpu: 0.0.40
codegen_flags: <defaults>
</compile_context>

<pallas_src>
import functools
import math

import jax
import jax.numpy as jnp
from jax.experimental import pallas as pl
from jax.experimental.pallas import tpu as pltpu


def _attention_summarize_kernel(h_ref, w_ref, out_ref, alpha_ref, *,
                                summary_mode, att_mode, att_bias, inv_temp,
                                transpose_out):
    # h_ref:     (TB, L, C) VMEM, input dtype (f32 or bf16)
    # w_ref:     (3, C)     VMEM f32, rows = [wq, wk, welem]
    # out_ref:   (C, TB) if transpose_out else (TB, C)
    # alpha_ref: (L, TB)    VMEM f32 (batch on lanes -> lane-dense stores)
    h = h_ref[...]                                      # stays in the input dtype
    TB, L, C = h.shape
    f32 = jnp.float32
    w3 = w_ref[...]                                     # (3, C) f32
    wq = w3[0:1, :]                                     # (1, C): broadcasts over (TB, L, C)
    wk = w3[1:2, :]
    welem = w3[2:3, :]

    q = h
    if summary_mode == 'vanilla':
        k = h[:, L - 1:L, :]                            # (TB, 1, C): last layer, implicit bcast
    elif summary_mode == 'roll':
        # torch.roll(h, -1, dims=1): k[:, i] = h[:, i+1]; the wrapped-around last row is
        # masked out of the softmax below, so its value never matters.
        # (pltpu.roll would use the otherwise-idle XLU rotate slot, but its lowering
        #  requires a 128-aligned lane dim; with C < 128 it does not lower, so keep the
        #  concatenate — in the input dtype, so bf16 inputs pay half.)
        k = jnp.concatenate([h[:, 1:, :], h[:, :1, :]], axis=1)     # (TB, L, C)
    else:
        raise NotImplementedError(summary_mode)

    def csum(x):                                        # channel reduce, f32 accumulation
        return jnp.sum(x.astype(f32), axis=-1)

    inv_sqrt = 1.0 / math.sqrt(C)

    if att_mode == 'dp':
        alpha = csum(q * k) * inv_sqrt                                   # (TB, L)
    elif att_mode == 'wdp':
        alpha = csum((q * k) * welem) * inv_sqrt                         # (TB, L)
    elif att_mode in ('ad', 'mx'):
        if summary_mode == 'vanilla':
            # key is a single layer -> its wk projection is (TB, 1): tiny reduce.
            ad = csum(q * wq) + csum(k * wk) + att_bias                  # (TB,L)+(TB,1)+b
        else:
            # fused: one full-tile lane reduce instead of two (XLU is the scarce slot).
            ad = csum(q * wq + k * wk) + att_bias                        # (TB, L)
        if att_mode == 'ad':
            alpha = ad
        else:                                                            # 'mx'
            alpha = ad * jax.nn.sigmoid(csum(q * k))                     # (TB, L)
    else:
        raise NotImplementedError(att_mode)

    scaled = alpha * inv_temp                           # (TB, L) f32
    if summary_mode == 'roll':
        # Drop the wrapped-around last layer from the softmax (mask BEFORE the max) so
        # its weight is exactly 0 and every intermediate keeps the full 8-sublane L axis.
        layer = jax.lax.broadcasted_iota(jnp.int32, scaled.shape, 1)
        scaled = jnp.where(layer < L - 1, scaled, -jnp.inf)

    # numerically stable softmax over the layer axis (exact divide: approx reciprocal's
    # ~2^-12 error would break the 1e-5 check and the divide is only (TB, L)-sized).
    m = jnp.max(scaled, axis=1, keepdims=True)          # (TB, 1)
    e = jnp.exp(scaled - m)                             # (TB, L)
    a = e / jnp.sum(e, axis=1, keepdims=True)           # (TB, L); 'roll': a[:, L-1] == 0

    out = jnp.sum(h * a[:, :, None], axis=1)            # (TB, C) f32 (h promoted per-element)
    if transpose_out:
        out_ref[...] = out.T.astype(out_ref.dtype)      # (C, TB), lane-dense write
    else:
        out_ref[...] = out.astype(out_ref.dtype)        # (TB, C): C >= 128, already dense
    alpha_ref[...] = a.T.astype(alpha_ref.dtype)        # (L, TB), lane-dense write


def _round_up(x, m):
    return (x + m - 1) // m * m


def _vmem_limit_bytes():
    """Scoped-VMEM limit to request: ~3/4 of physical capacity, clamped to [32, 64] MiB.

    v5e/v6e have 128 MiB physical (16/32 MiB scoped defaults), v7x only 64 MiB per TC;
    the clamp keeps the request legal everywhere while lifting the small defaults."""
    cap = 64 * 1024 * 1024                               # conservative fallback (v7x per-TC)
    try:
        cap = int(pltpu.get_tpu_info().vmem_capacity_bytes)
    except Exception:
        pass
    return int(min(max((cap * 3) // 4, 32 * 1024 * 1024), 64 * 1024 * 1024))


def _per_row_vmem_bytes(L, C, in_itemsize, summary_mode):
    """Padded VMEM bytes one batch row costs inside the kernel.

    Includes lane padding (C -> 128) and sublane padding (L -> 8, or 16 for 16-bit packed
    dtypes), the x2 double-buffered pipelined h block, the full-tile f32 intermediates
    the body materialises (q*k, q*wq(+k*wk), the rolled key copy, h*a — counted
    generously since the compiler fuses some), and the small softmax temporaries."""
    lanes = _round_up(C, 128)
    sub_f32 = _round_up(L, 8)
    sub_in = _round_up(L, 8 * max(1, 4 // in_itemsize))
    full_f32 = sub_f32 * lanes * 4
    in_tile = sub_in * lanes * in_itemsize
    n_work = 5 if summary_mode == 'roll' else 4
    return 2 * in_tile + n_work * full_f32 + 8 * 128 * 4


def _pick_batch_tile(B, L, C, in_itemsize, summary_mode, vmem_limit):
    # Fill at most ~60% of the requested VMEM limit (headroom for compiler scratch,
    # the w3 block and anything the estimate misses).
    budget = (vmem_limit * 3) // 5
    tb = max(1, budget // _per_row_vmem_bytes(L, C, in_itemsize, summary_mode))
    # v7x: keep the batch grid >= 2 steps so the "parallel" axis spans both TensorCores
    # (otherwise one TC idles -> straight 2x loss). No effect on v5e/v6e (single TC).
    tb = min(tb, _round_up(pl.cdiv(B, 2), 128))
    if B <= tb:
        return B                                         # single full-batch block
    # Partial-batch tiles: multiple of 128 so the (C|L, TB) lane-dense output blocks and
    # the (TB, ...) sublane dims all satisfy the (8, 128) divisibility rules.
    return max(128, (tb // 128) * 128)


def attention_summarize(h, wq, wk, welem, att_bias, temperature,
                        *, summary_mode='vanilla', att_mode='mx', batch_tile=None):
    """h: (B, L, C) float32 or bfloat16 (bf16 halves HBM traffic; accumulation stays f32).

    Mirrors AttentionSummarize.forward for summary_mode in {'vanilla', 'roll'}.
    Returns (summary (B, C), alpha (B, L) for 'vanilla' / (B, L-1) for 'roll')."""
    B, L, C = h.shape
    if summary_mode not in ('vanilla', 'roll'):
        # TODO(synk): summary_mode == 'lstm' needs a bidirectional LSTM; not implemented.
        raise NotImplementedError(summary_mode)
    if att_mode not in ('dp', 'wdp', 'ad', 'mx'):
        raise NotImplementedError(att_mode)

    w3 = jnp.stack([jnp.asarray(wq).reshape(-1),
                    jnp.asarray(wk).reshape(-1),
                    jnp.asarray(welem).reshape(-1)]).astype(jnp.float32)     # (3, C)

    vmem_limit = _vmem_limit_bytes()
    if batch_tile is None:
        TB = _pick_batch_tile(B, L, C, h.dtype.itemsize, summary_mode, vmem_limit)
    else:
        TB = min(int(batch_tile), B)
        if TB < B:
            TB = max(128, (TB // 128) * 128)             # keep blocks (8,128)-legal
    grid = (pl.cdiv(B, TB),)

    # Lane-dense summary store: at C < 128 a (TB, C) block only fills C/128 lanes and
    # forces masked partial stores; store (C, TB) instead and transpose back outside.
    transpose_out = C < 128

    kernel = functools.partial(
        _attention_summarize_kernel,
        summary_mode=summary_mode, att_mode=att_mode,
        att_bias=float(att_bias), inv_temp=1.0 / float(temperature),
        transpose_out=transpose_out)

    if transpose_out:
        out_shape0 = jax.ShapeDtypeStruct((C, B), h.dtype)
        out_spec0 = pl.BlockSpec((C, TB), lambda b: (0, b))
    else:
        out_shape0 = jax.ShapeDtypeStruct((B, C), h.dtype)
        out_spec0 = pl.BlockSpec((TB, C), lambda b: (b, 0))

    out_raw, alpha_t = pl.pallas_call(
        kernel,
        out_shape=(out_shape0, jax.ShapeDtypeStruct((L, B), jnp.float32)),
        grid_spec=pltpu.PrefetchScalarGridSpec(
            num_scalar_prefetch=0,
            grid=grid,
            in_specs=[
                pl.BlockSpec((TB, L, C), lambda b: (b, 0, 0)),
                pl.BlockSpec((3, C), lambda b: (0, 0)),
            ],
            out_specs=(out_spec0,
                       pl.BlockSpec((L, TB), lambda b: (0, b))),
        ),
        compiler_params=pltpu.CompilerParams(
            dimension_semantics=("parallel",),           # batch axis carries no accumulator
            vmem_limit_bytes=vmem_limit),
    )(h, w3)

    out = out_raw.T if transpose_out else out_raw        # (B, C)
    alpha = alpha_t.T                                    # (B, L)
    if summary_mode == 'roll':
        alpha = alpha[:, :L - 1]
    return out, alpha


def reference(h, wq, wk, welem, att_bias, temperature, summary_mode, att_mode):
    """Pure-JAX mirror of the PyTorch forward (for the supported modes)."""
    if summary_mode == 'vanilla':
        q, k, hh = h, jnp.broadcast_to(h[:, -1:, :], h.shape), h
    elif summary_mode == 'roll':
        q = h[:, :-1]
        k = jnp.roll(h, -1, axis=1)[:, :-1]
        hh = h[:, :-1]
    C = q.shape[-1]
    if att_mode == 'dp':
        alpha = (q * k).sum(-1) / math.sqrt(C)
    elif att_mode == 'wdp':
        alpha = (q * k * welem[0]).sum(-1) / math.sqrt(C)
    elif att_mode == 'ad':
        alpha = (q * wq[0]).sum(-1) + (k * wk[0]).sum(-1) + att_bias
    elif att_mode == 'mx':
        ad = (q * wq[0]).sum(-1) + (k * wk[0]).sum(-1) + att_bias
        alpha = ad * jax.nn.sigmoid((q * k).sum(-1))
    a = jax.nn.softmax(alpha / temperature, axis=-1)
    return (hh * a[..., None]).sum(axis=1), a


if __name__ == "__main__":
    temperature = 2.0
    key = jax.random.PRNGKey(0)
    k_hs, k_w, k_b = jax.random.split(key, 3)

    ok = True
    # Second config exercises the multi-step batch-tiled grid (auto TB -> 128, grid=(2,)).
    for (B, L, C) in [(2, 8, 32), (256, 8, 32)]:
        # The module's forward takes a list/tuple of per-layer hidden states (B, C).
        hs = [jax.random.normal(jax.random.fold_in(k_hs, i), (B, C), jnp.float32)
              for i in range(L)]
        h = jnp.stack(hs, axis=1)                              # (B, L, C)

        # Deterministic parameter init (shapes from __init__: Linear(2C -> 1), weight=ones(C)).
        bound = 1.0 / math.sqrt(2 * C)
        att_w = jax.random.uniform(k_w, (1, 2 * C), jnp.float32, -bound, bound)
        att_b = float(jax.random.uniform(k_b, (), jnp.float32, -bound, bound))
        wq = att_w[:, :C]                                      # (1, C)
        wk = att_w[:, C:]                                      # (1, C)
        welem = jnp.ones((1, C), jnp.float32)                  # self.weight

        for summary_mode, att_mode in [('vanilla', 'mx'), ('vanilla', 'dp'),
                                       ('vanilla', 'ad'), ('roll', 'wdp'),
                                       ('roll', 'mx')]:
            out, alpha = attention_summarize(h, wq, wk, welem, att_b, temperature,
                                             summary_mode=summary_mode,
                                             att_mode=att_mode)
            out, alpha = jax.block_until_ready((out, alpha))
            out_ref, alpha_ref = reference(h, wq, wk, welem, att_b, temperature,
                                           summary_mode, att_mode)
            ok &= bool(jnp.allclose(out, out_ref, rtol=1e-5, atol=1e-5))
            ok &= bool(jnp.allclose(alpha, alpha_ref, rtol=1e-5, atol=1e-5))

    if ok:
        print("KERNEL_OK")
    else:
        print("MISMATCH")
</pallas_src>

<mosaic_0001>
module attributes {stable_mosaic.version = 11 : i64} {
  func.func @_attention_summarize_kernel(%arg0: i32, %arg1: memref<2x8x32xf32, #tpu.memory_space<vmem>>, %arg2: memref<3x32xf32, #tpu.memory_space<vmem>>, %arg3: memref<32x2xf32, #tpu.memory_space<vmem>>, %arg4: memref<8x2xf32, #tpu.memory_space<vmem>>) attributes {dimension_semantics = [#tpu.dimension_semantics<parallel>], iteration_bounds = array<i64: 1>, scalar_prefetch = 0 : i64, scratch_operands = 0 : i64, tpu.core_type = #tpu.core_type<tc>, window_params = [{transform_indices = @transform_0, window_bounds = array<i64: 2, 8, 32>}, {pipeline_mode = #tpu.pipeline_mode<synchronous>, transform_indices = @transform_1, window_bounds = array<i64: 3, 32>}, {transform_indices = @transform_2, window_bounds = array<i64: 32, 2>}, {transform_indices = @transform_3, window_bounds = array<i64: 8, 2>}]} {
    %c0 = arith.constant 0 : index
    %c0_0 = arith.constant 0 : index
    %c0_1 = arith.constant 0 : index
    %0 = vector.load %arg1[%c0, %c0_0, %c0_1] : memref<2x8x32xf32, #tpu.memory_space<vmem>>, vector<2x8x32xf32>
    %c0_2 = arith.constant 0 : index
    %c0_3 = arith.constant 0 : index
    %1 = vector.load %arg2[%c0_2, %c0_3] : memref<3x32xf32, #tpu.memory_space<vmem>>, vector<3x32xf32>
    %2 = vector.extract_strided_slice %1 {offsets = [0, 0], sizes = [1, 32], strides = [1, 1]} : vector<3x32xf32> to vector<1x32xf32>
    %3 = vector.extract_strided_slice %1 {offsets = [1, 0], sizes = [1, 32], strides = [1, 1]} : vector<3x32xf32> to vector<1x32xf32>
    %4 = vector.extract_strided_slice %0 {offsets = [0, 7, 0], sizes = [2, 1, 32], strides = [1, 1, 1]} : vector<2x8x32xf32> to vector<2x1x32xf32>
    %5 = vector.shape_cast %2 : vector<1x32xf32> to vector<1x1x32xf32>
    %6 = vector.broadcast %5 : vector<1x1x32xf32> to vector<2x8x32xf32>
    %7 = arith.mulf %0, %6 : vector<2x8x32xf32>
    %cst = arith.constant dense<0.000000e+00> : vector<2x8xf32>
    %8 = vector.multi_reduction <add>, %7, %cst [2] : vector<2x8x32xf32> to vector<2x8xf32>
    %9 = vector.shape_cast %3 : vector<1x32xf32> to vector<1x1x32xf32>
    %10 = vector.broadcast %9 : vector<1x1x32xf32> to vector<2x1x32xf32>
    %11 = arith.mulf %4, %10 : vector<2x1x32xf32>
    %cst_4 = arith.constant dense<0.000000e+00> : vector<2x1xf32>
    %12 = vector.multi_reduction <add>, %11, %cst_4 [2] : vector<2x1x32xf32> to vector<2x1xf32>
    %13 = vector.broadcast %12 : vector<2x1xf32> to vector<2x8xf32>
    %14 = arith.addf %8, %13 : vector<2x8xf32>
    %cst_5 = arith.constant 0.100612372 : f32
    %15 = vector.broadcast %cst_5 : f32 to vector<2x8xf32>
    %16 = arith.addf %14, %15 : vector<2x8xf32>
    %17 = vector.broadcast %4 : vector<2x1x32xf32> to vector<2x8x32xf32>
    %18 = arith.mulf %0, %17 : vector<2x8x32xf32>
    %cst_6 = arith.constant dense<0.000000e+00> : vector<2x8xf32>
    %19 = vector.multi_reduction <add>, %18, %cst_6 [2] : vector<2x8x32xf32> to vector<2x8xf32>
    %20 = arith.negf %19 : vector<2x8xf32>
    %21 = math.exp %20 : vector<2x8xf32>
    %cst_7 = arith.constant 1.000000e+00 : f32
    %22 = vector.broadcast %cst_7 : f32 to vector<2x8xf32>
    %23 = arith.addf %22, %21 : vector<2x8xf32>
    %24 = arith.divf %22, %23 : vector<2x8xf32>
    %25 = arith.mulf %16, %24 : vector<2x8xf32>
    %cst_8 = arith.constant 5.000000e-01 : f32
    %26 = vector.broadcast %cst_8 : f32 to vector<2x8xf32>
    %27 = arith.mulf %25, %26 : vector<2x8xf32>
    %cst_9 = arith.constant dense<0xFF800000> : vector<2xf32>
    %28 = vector.multi_reduction <maximumf>, %27, %cst_9 [1] : vector<2x8xf32> to vector<2xf32>
    %29 = vector.shape_cast %28 : vector<2xf32> to vector<2x1xf32>
    %30 = vector.broadcast %29 : vector<2x1xf32> to vector<2x8xf32>
    %31 = arith.subf %27, %30 : vector<2x8xf32>
    %32 = math.exp %31 : vector<2x8xf32>
    %cst_10 = arith.constant dense<0.000000e+00> : vector<2xf32>
    %33 = vector.multi_reduction <add>, %32, %cst_10 [1] : vector<2x8xf32> to vector<2xf32>
    %34 = vector.shape_cast %33 : vector<2xf32> to vector<2x1xf32>
    %35 = vector.broadcast %34 : vector<2x1xf32> to vector<2x8xf32>
    %36 = arith.divf %32, %35 : vector<2x8xf32>
    %37 = vector.shape_cast %36 : vector<2x8xf32> to vector<2x8x1xf32>
    %38 = vector.broadcast %37 : vector<2x8x1xf32> to vector<2x8x32xf32>
    %39 = arith.mulf %0, %38 : vector<2x8x32xf32>
    %cst_11 = arith.constant dense<0.000000e+00> : vector<2x32xf32>
    %40 = vector.multi_reduction <add>, %39, %cst_11 [1] : vector<2x8x32xf32> to vector<2x32xf32>
    %41 = tpu.transpose %40, [1, 0] : vector<2x32xf32> -> vector<32x2xf32>
    %c0_12 = arith.constant 0 : index
    %c0_13 = arith.constant 0 : index
    %42 = vector.load %arg3[%c0_12, %c0_13] : memref<32x2xf32, #tpu.memory_space<vmem>>, vector<32x2xf32>
    tpu.vector_store %arg3[%c0_12, %c0_13], %41 {strides = array<i32>} : memref<32x2xf32, #tpu.memory_space<vmem>>, vector<32x2xf32>,
    %43 = tpu.transpose %36, [1, 0] : vector<2x8xf32> -> vector<8x2xf32>
    %c0_14 = arith.constant 0 : index
    %c0_15 = arith.constant 0 : index
    %44 = vector.load %arg4[%c0_14, %c0_15] : memref<8x2xf32, #tpu.memory_space<vmem>>, vector<8x2xf32>
    tpu.vector_store %arg4[%c0_14, %c0_15], %43 {strides = array<i32>} : memref<8x2xf32, #tpu.memory_space<vmem>>, vector<8x2xf32>,
    return
  }
  func.func @transform_0(%arg0: i32) -> (i32, i32, i32) {
    %c0_i32 = arith.constant 0 : i32
    %c0_i32_0 = arith.constant 0 : i32
    %c0_i32_1 = arith.constant 0 : i32
    return %arg0, %c0_i32, %c0_i32_0 : i32, i32, i32
  }
  func.func @transform_1(%arg0: i32) -> (i32, i32) {
    %c0_i32 = arith.constant 0 : i32
    %c0_i32_0 = arith.constant 0 : i32
    %c0_i32_1 = arith.constant 0 : i32
    return %c0_i32, %c0_i32_0 : i32, i32
  }
  func.func @transform_2(%arg0: i32) -> (i32, i32) {
    %c0_i32 = arith.constant 0 : i32
    %c0_i32_0 = arith.constant 0 : i32
    return %c0_i32, %arg0 : i32, i32
  }
  func.func @transform_3(%arg0: i32) -> (i32, i32) {
    %c0_i32 = arith.constant 0 : i32
    %c0_i32_0 = arith.constant 0 : i32
    return %c0_i32, %arg0 : i32, i32
  }
}

</mosaic_0001>

<bundles_post_ra>
// kernel: tpu_custom_call.1
= control target key start
LH: loop header
LB: loop body
LE: loop exit
PB: predicated region body
PF: predicated region fallthrough
CT: control target
= control target key end

     0   :  { %9 = vsyncpa [#allocation3], 0  ;;  %s486_s0 = inlined_call_operand.hbm [shape: f32[2,8,32], index: 0, kind: input, shape index: {}]   ;;  %s487_s1 = inlined_call_operand.hbm [shape: f32[3,32], index: 1, kind: input, shape index: {}]   ;;  %s488_s2 = inlined_call_operand.vmem [shape: f32[32,2], index: 2, kind: output, shape index: {0}]   ;;  %s489_s3 = inlined_call_operand.vmem [shape: f32[8,2], index: 3, kind: output, shape index: {1}]  }
   0x1   :  { %10 = vsyncpa [#allocation5], 0  ;;  %s377_s12 = smov [#allocation2]   ;;  %s329_s16 = scalar_lea.hbm %s486_s0, 256 }
   0x2   :  { %s16_s13 = sshll.u32 %s377_s12, 4  ;;  %p330_p0 = scmp.ne.s32.totalorder %s486_s0, %s329_s16  ;;  %s17_s13 = int_to_ptr.vmem [resolvable:$true] %s16_s13 }
   0x3   :  { %p333_p1 = scmp.lt.u32.totalorder %s329_s16, %s486_s0 }
   0x5   :  { %p335_p2 = pnand %p333_p1, %p330_p0 }
   0x7   :  { %338 = shalt.err (!%p335_p2)
}
   0x8   :  { %s339_s21 = scalar_lea.vmem %s17_s13, 256  ;;  %p344_p4 = scmp.lt.s32.totalorder %s17_s13, %s17_s13 }
   0x9   :  { %p340_p3 = scmp.ne.s32.totalorder %s17_s13, %s339_s21  ;;  %p345_p5 = scmp.lt.s32.totalorder %s339_s21, %s339_s21 }
   0xb   :  { %p346_p6 = por %p345_p5, %p344_p4 }
   0xd   :  { %p347_p7 = pnand %p346_p6, %p340_p3 }
   0xf   :  { %350 = shalt.err (!%p347_p7)
}
  0x10   :  { %s378_s22 = smov 128   ;;  %s379_s23 = smov 8  }
  0x11   :  { %22 = dma.hbm_to_vmem [thread:$0]  %s486_s0, 256, %s17_s13, [#allocation3], %s378_s22, %s378_s22, %s379_s23  }
  0x12   :  { %s380_s26 = smov [#allocation4]   ;;  %s351_s30 = scalar_lea.hbm %s487_s1, 64 }
  0x13   :  { %s29_s27 = sshll.u32 %s380_s26, 4  ;;  %p352_p8 = scmp.ne.s32.totalorder %s487_s1, %s351_s30  ;;  %s30_s27 = int_to_ptr.vmem [resolvable:$true] %s29_s27 }
  0x14   :  { %p355_p9 = scmp.lt.u32.totalorder %s351_s30, %s487_s1 }
  0x16   :  { %p357_p10 = pnand %p355_p9, %p352_p8 }
  0x18   :  { %360 = shalt.err (!%p357_p10)
}
  0x19   :  { %s361_s8 = scalar_lea.vmem %s30_s27, 64  ;;  %p366_p12 = scmp.lt.s32.totalorder %s30_s27, %s30_s27 }
  0x1a   :  { %p362_p11 = scmp.ne.s32.totalorder %s30_s27, %s361_s8  ;;  %p367_p13 = scmp.lt.s32.totalorder %s361_s8, %s361_s8 }
  0x1c   :  { %p368_p0 = por %p367_p13, %p366_p12 }
  0x1e   :  { %p369_p1 = pnand %p368_p0, %p362_p11 }
  0x20   :  { %372 = shalt.err (!%p369_p1)
}
  0x21   :  { %32 = dma.hbm_to_vmem [thread:$0]  %s487_s1, 64, %s30_s27, [#allocation5]  }
  0x22   :  { %373 = dma.done.wait [#allocation3], 256  }
  0x23   :  { %374 = vsyncadd [#allocation3], 4294967040 }
  0x24   :  { %375 = dma.done.wait [#allocation5], 64  }
  0x25   :  { %376 = vsyncadd [#allocation5], 4294967232  ;;  %v42_v0 = vlaneseq  ;;  %v432_v4 = vld [vmem:[#allocation2] sm:$0xff]  ;;  %v434_v5 = vld [vmem:[#allocation2 + $0x8] sm:$0xff]  ;;  %vm48_vm0 = vcmask 261120   ;;  %vm60_vm1 = vcmask 261127  }
  0x26   :  { %v41_v6 = vld [vmem:[#allocation4] sm:$0x7]  ;;  %vm123_vm2 = vcmask 1041409   ;;  %vm126_vm3 = vcmask 58368   ;;  %v381_v53 = vmov 0   ;;  %vm245_vm4 = vcmask 15360  }
  0x27   :  { %v426_v1 = vshrl.u32 %v42_v0, 7  ;;  %v56_v9 = vrot.slane %v41_v6, 2  ;;  %v114_v23 = vand.u32 127, %v42_v0  ;;  %312 = vset.pattern.permute.xlu0 %v381_v53  ;;  %311 = vset.pattern.permute.xlu1 %v381_v53 }
  0x29   :  { %v69_v2 = vsub.s32 7, %v426_v1  ;;  %v430_v3 = vsub.s32 0, %v426_v1  ;;  %v58_v13 = vmul.f32 %v56_v9, %v432_v4  ;;  %v59_v14 = vmul.f32 %v56_v9, %v434_v5 }
  0x2a   :  { %v450_v24 = vsub.s32 %v114_v23, %v426_v1  ;;  %v137_v54 = vsub.s32 1, %v426_v1 }
  0x2b   :  { %v82_v7 = vrot.slane %v432_v4, %v69_v2  ;;  %v86_v8 = vrot.slane %v434_v5, %v69_v2  ;;  %v45_v10 = vrot.slane %v41_v6, %v430_v3  ;;  %v61_v16 = vsel %vm60_vm1, %v58_v13, 0.0 }
  0x2c   :  { %62 = vadd.xlane.f32.xlu1 %v61_v16  ;;  %v64_v18 = vsel %vm60_vm1, %v59_v14, 0.0 }
  0x2d   :  { %v87_v11 = vmul.f32 %v82_v7, %v432_v4  ;;  %v88_v12 = vmul.f32 %v86_v8, %v434_v5  ;;  %v46_v19 = vmul.f32 %v45_v10, %v432_v4  ;;  %v47_v20 = vmul.f32 %v45_v10, %v434_v5 }
  0x2f   :  { %v89_v15 = vsel %vm48_vm0, %v87_v11, 0.0  ;;  %v92_v17 = vsel %vm48_vm0, %v88_v12, 0.0  ;;  %v49_v21 = vsel %vm48_vm0, %v46_v19, 0.0  ;;  %v52_v22 = vsel %vm48_vm0, %v47_v20, 0.0 }
  0x30   :  { %90 = vadd.xlane.f32.xlu0 %v89_v15  ;;  %65 = vadd.xlane.f32.xlu1 %v64_v18 }
  0x34   :  { %93 = vadd.xlane.f32.xlu0 %v92_v17  ;;  %53 = vadd.xlane.f32.xlu1 %v52_v22 }
  0x38   :  { %50 = vadd.xlane.f32.xlu0 %v49_v21 }
  0xb9   :  { %v63_v29 = vpop.xlane.xlu1 %62 }
  0xba   :  { %v70_v34 = vrot.slane %v63_v29, %v69_v2 }
  0xbd   :  { %v91_v25 = vpop.xlane.xlu0 %90  ;;  %v66_v32 = vpop.xlane.xlu1 %65 }
  0xbe   :  { %v303_v26 = vmul.f32 -1.442695, %v91_v25  ;;  %v74_v37 = vrot.slane %v66_v32, %v69_v2 }
  0xc0   :  { %313 = vpow2.f32 %v303_v26 }
  0xc1   :  { %v94_v27 = vpop.xlane.xlu0 %93  ;;  %v54_v39 = vpop.xlane.xlu1 %53 }
  0xc2   :  { %v304_v28 = vmul.f32 -1.442695, %v94_v27  ;;  %v76_v41 = vadd.f32 %v74_v37, %v54_v39 }
  0xc4   :  { %315 = vpow2.f32 %v304_v28  ;;  %v78_v44 = vadd.f32 0.10061237, %v76_v41 }
  0xc5   :  { %v51_v36 = vpop.xlane.xlu0 %50 }
  0xc6   :  { %v75_v38 = vadd.f32 %v70_v34, %v51_v36 }
  0xc8   :  { %v77_v40 = vadd.f32 0.10061237, %v75_v38 }
  0xca   :  { %v314_v30 = vpop.eup %313 }
  0xcb   :  { %v101_v31 = vadd.f32 1.0, %v314_v30 }
  0xcd   :  { %317 = vrcp.f32 %v101_v31 }
  0xce   :  { %v316_v33 = vpop.eup %315 }
  0xcf   :  { %v102_v35 = vadd.f32 1.0, %v316_v33 }
  0xd1   :  { %319 = vrcp.f32 %v102_v35 }
  0xd7   :  { %v318_v42 = vpop.eup %317 }
  0xd8   :  { %v107_v43 = vmul.f32 %v318_v42, %v77_v40 }
  0xda   :  { %v109_v46 = vmul.f32 0.5, %v107_v43 }
  0xdb   :  { %v320_v45 = vpop.eup %319 }
  0xdc   :  { %v108_v47 = vmul.f32 %v320_v45, %v78_v44  ;;  %v118_v49 = vrot.slane %v109_v46, %v450_v24 }
  0xde   :  { %v110_v48 = vmul.f32 0.5, %v108_v47 }
  0xe0   :  { %v122_v50 = vrot.slane %v110_v48, %v450_v24 }
  0xe2   :  { %v124_v51 = vsel %vm123_vm2, %v122_v50, %v118_v49 }
  0xe3   :  { %v127_v52 = vsel %vm126_vm3, %v124_v51, -inf }
  0xe4   :  { %128 = vmax.xlane.f32.xlu0 %v127_v52 }
 0x171   :  { %v129_v55 = vpop.xlane.xlu0 %128 }
 0x172   :  { %v134_v56 = vrot.slane %v129_v55, %v430_v3  ;;  %v138_v57 = vrot.slane %v129_v55, %v137_v54 }
 0x174   :  { %v141_v58 = vsub.f32 %v109_v46, %v134_v56  ;;  %v142_v59 = vsub.f32 %v110_v48, %v138_v57 }
 0x176   :  { %v143_v60 = vmul.f32 1.442695, %v141_v58  ;;  %v145_v61 = vmul.f32 1.442695, %v142_v59 }
 0x178   :  { %321 = vpow2.f32 %v143_v60 }
 0x179   :  { %323 = vpow2.f32 %v145_v61 }
 0x182   :  { %v322_v62 = vpop.eup %321 }
 0x183   :  { %v324_v63 = vpop.eup %323  ;;  %150 = vperm.xlu1 %311, %v322_v62  }
 0x184   :  { %153 = vperm.xlu0 %312, %v324_v63  }
 0x202   :  { %v151_v0 = vpop.permute.xlu1 %150 }
 0x203   :  { %v154_v2 = vpop.permute.xlu0 %153  ;;  %v158_v6 = vrot.slane %v151_v0, %v450_v24 }
 0x204   :  { %v162_v1 = vrot.slane %v154_v2, %v450_v24 }
 0x206   :  { %v163_v7 = vsel %vm123_vm2, %v162_v1, %v158_v6 }
 0x207   :  { %v165_v8 = vsel %vm126_vm3, %v163_v7, 0.0 }
 0x208   :  { %166 = vadd.xlane.f32.xlu1 %v165_v8 }
 0x295   :  { %v167_v9 = vpop.xlane.xlu1 %166 }
 0x296   :  { %v172_v10 = vrot.slane %v167_v9, %v430_v3  ;;  %v176_v11 = vrot.slane %v167_v9, %v137_v54 }
 0x298   :  { %325 = vrcp.f32 %v172_v10 }
 0x299   :  { %327 = vrcp.f32 %v176_v11 }
 0x2a2   :  { %v326_v12 = vpop.eup %325 }
 0x2a3   :  { %v180_v13 = vmul.f32 %v326_v12, %v322_v62  ;;  %v328_v14 = vpop.eup %327 }
 0x2a4   :  { %v182_v15 = vmul.f32 %v328_v14, %v324_v63 }
 0x2a5   :  { %185 = vperm.xlu0 %312, %v180_v13  }
 0x2a9   :  { %190 = vperm.xlu0 %312, %v182_v15  }
 0x324   :  { %v186_v16 = vpop.permute.xlu0 %185 }
 0x325   :  { %v193_v17 = vmul.f32 %v186_v16, %v432_v4  ;;  %v253_v21 = vrot.slane %v186_v16, %v450_v24 }
 0x327   :  { %v195_v18 = vsel %vm48_vm0, %v193_v17, 0.0 }
 0x328   :  { %v196_v19 = vrot.slane %v195_v18, 4  ;;  %v191_v20 = vpop.permute.xlu0 %190 }
 0x329   :  { %v194_v3 = vmul.f32 %v191_v20, %v434_v5  ;;  %v257_v22 = vrot.slane %v191_v20, %v450_v24 }
 0x32a   :  { %v197_v23 = vadd.f32 %v196_v19, %v195_v18 }
 0x32b   :  { %v202_v25 = vsel %vm48_vm0, %v194_v3, 0.0  ;;  %v258_v26 = vsel %vm123_vm2, %v257_v22, %v253_v21 }
 0x32c   :  { %v198_v27 = vrot.slane %v197_v23, 2  ;;  %v203_v28 = vrot.slane %v202_v25, 4  ;;  %260 = vxpose.xlu0.b32.start.end [1/1] (short) (narrow) %v258_v26, 8 }
 0x32e   :  { %v199_v29 = vadd.f32 %v198_v27, %v197_v23  ;;  %v204_v4 = vadd.f32 %v203_v28, %v202_v25 }
 0x330   :  { %v205_v30 = vrot.slane %v204_v4, 2  ;;  %v200_v32 = vrot.slane %v199_v29, 1 }
 0x332   :  { %v206_v31 = vadd.f32 %v205_v30, %v204_v4  ;;  %v201_v34 = vadd.f32 %v200_v32, %v199_v29 }
 0x334   :  { %v207_v33 = vrot.slane %v206_v31, 1 }
 0x336   :  { %v208_v35 = vadd.f32 %v207_v33, %v206_v31 }
 0x338   :  { %v211_v5 = vsel %vm123_vm2, %v208_v35, %v201_v34 }
 0x339   :  { %213 = vxpose.xlu1.b32.start.end [1/1] (short) (narrow) %v211_v5, 32 }
 0x3ac   :  { %v276_v24 = vpop.trf.xlu0 }
 0x3ad   :  { %292 = vst.msk [vmem:[%s489_s3] sm:$0xff] %vm245_vm4, %v276_v24 }
 0x3b9   :  { %v229_v36 = vpop.trf.xlu1 }
 0x3ba   :  { %246 = vst.msk [vmem:[%s488_s2] sm:$0xff] %vm245_vm4, %v229_v36 }
 0x3bd   :  { %v230_v37 = vpop.trf.xlu1 }
 0x3be   :  { %247 = vst.msk [vmem:[%s488_s2 + $0x8] sm:$0xff] %vm245_vm4, %v230_v37 }
 0x3c1   :  { %v231_v38 = vpop.trf.xlu1 }
 0x3c2   :  { %248 = vst.msk [vmem:[%s488_s2 + $0x10] sm:$0xff] %vm245_vm4, %v231_v38 }
 0x3c5   :  { %v232_v39 = vpop.trf.xlu1 }
 0x3c6   :  { %249 = vst.msk [vmem:[%s488_s2 + $0x18] sm:$0xff] %vm245_vm4, %v232_v39 }
 0x3c7   :  { %301 = vsyncpa [#allocation3], 1 }
 0x3c8   :  { %302 = vsyncpa [#allocation5], 1 }

</bundles_post_ra>
